<compile_context>
chip_gen: v7x
topology: tpu7x:2x2x1
jax: 0.10.0
libtpu: 0.0.40
codegen_flags: <defaults>
</compile_context>

<pallas_src>
import jax
import jax.numpy as jnp
from jax.experimental import pallas as pl
from jax.experimental.pallas import tpu as pltpu

# ---- model hyper-parameters (small, consistent with the module) ----
B = 2        # batch
S = 8        # sequence length
D_MODEL = 32
D_FF = 64
N = B * S    # flattened rows fed to the kernel


def ffn_kernel(x_ref, w1_ref, b1_ref, w2_ref, b2_ref, out_ref):
    # x_ref: (N, D_MODEL); weights are full-array VMEM blocks.
    x = x_ref[...]                                                # (N, D)
    h = jnp.dot(x, w1_ref[...], preferred_element_type=jnp.float32) + b1_ref[...]
    h = jnp.maximum(h, 0.0)                                       # ReLU
    # TODO(synk): nn.Dropout is identity here (eval mode); training-mode dropout
    # would need pltpu.prng_seed / pltpu.prng_random_bits masking.
    y = jnp.dot(h, w2_ref[...], preferred_element_type=jnp.float32) + b2_ref[...]
    out_ref[...] = y.astype(out_ref.dtype)


def feed_forward_block(x, w1, b1, w2, b2):
    """x: (B, S, D_MODEL).  Returns (B, S, D_MODEL)."""
    b, s, d = x.shape
    n = b * s
    x2 = x.reshape(n, d)   # fold batch+seq into one slab -> single kernel invocation

    fn = pl.pallas_call(
        ffn_kernel,
        out_shape=jax.ShapeDtypeStruct((n, d), jnp.float32),
        grid_spec=pltpu.PrefetchScalarGridSpec(
            num_scalar_prefetch=0,
            grid=(1,),  # single step: no per-batch grid overhead
            in_specs=[
                pl.BlockSpec((n, d), lambda i: (0, 0)),            # x (flattened)
                pl.BlockSpec(w1.shape, lambda i: (0, 0)),          # W1 (D, D_FF)
                pl.BlockSpec(b1.shape, lambda i: (0, 0)),          # b1 (1, D_FF)
                pl.BlockSpec(w2.shape, lambda i: (0, 0)),          # W2 (D_FF, D)
                pl.BlockSpec(b2.shape, lambda i: (0, 0)),          # b2 (1, D)
            ],
            out_specs=pl.BlockSpec((n, d), lambda i: (0, 0)),
        ),
        compiler_params=pltpu.CompilerParams(
            dimension_semantics=("arbitrary",)),
    )
    out = fn(x2, w1, b1, w2, b2)
    return out.reshape(b, s, d)


# ------------------------- pure-JAX reference -------------------------
def feed_forward_ref(x, w1, b1, w2, b2):
    h = jnp.maximum(x @ w1 + b1, 0.0)
    return h @ w2 + b2


# ------------------------------ main ------------------------------
if __name__ == "__main__":
    key = jax.random.PRNGKey(0)
    k_x, k_w1, k_b1, k_w2, k_b2 = jax.random.split(key, 5)

    # nn.Linear(in, out) stored as (in, out) so y = x @ W + b (same math as
    # x @ weight.T + bias in torch).
    def w(k, shape, scale=0.05):
        return (scale * jax.random.normal(k, shape)).astype(jnp.float32)

    w1 = w(k_w1, (D_MODEL, D_FF))
    b1 = w(k_b1, (1, D_FF))
    w2 = w(k_w2, (D_FF, D_MODEL))
    b2 = w(k_b2, (1, D_MODEL))

    x = jax.random.normal(k_x, (B, S, D_MODEL), jnp.float32)

    out = feed_forward_block(x, w1, b1, w2, b2)
    out = jax.block_until_ready(out)

    ref = feed_forward_ref(x, w1, b1, w2, b2)
    assert out.shape == (B, S, D_MODEL)
    assert jnp.allclose(out, ref, atol=1e-5, rtol=1e-5), "kernel does not match reference"

    print("KERNEL_OK")
</pallas_src>

<mosaic_0001>
module attributes {stable_mosaic.version = 11 : i64} {
  func.func @ffn_kernel(%arg0: i32, %arg1: memref<16x32xf32, #tpu.memory_space<vmem>>, %arg2: memref<32x64xf32, #tpu.memory_space<vmem>>, %arg3: memref<1x64xf32, #tpu.memory_space<vmem>>, %arg4: memref<64x32xf32, #tpu.memory_space<vmem>>, %arg5: memref<1x32xf32, #tpu.memory_space<vmem>>, %arg6: memref<16x32xf32, #tpu.memory_space<vmem>>) attributes {dimension_semantics = [#tpu.dimension_semantics<arbitrary>], iteration_bounds = array<i64: 1>, scalar_prefetch = 0 : i64, scratch_operands = 0 : i64, tpu.core_type = #tpu.core_type<tc>, window_params = [{pipeline_mode = #tpu.pipeline_mode<synchronous>, transform_indices = @transform_0, window_bounds = array<i64: 16, 32>}, {pipeline_mode = #tpu.pipeline_mode<synchronous>, transform_indices = @transform_1, window_bounds = array<i64: 32, 64>}, {pipeline_mode = #tpu.pipeline_mode<synchronous>, transform_indices = @transform_2, window_bounds = array<i64: 1, 64>}, {pipeline_mode = #tpu.pipeline_mode<synchronous>, transform_indices = @transform_3, window_bounds = array<i64: 64, 32>}, {pipeline_mode = #tpu.pipeline_mode<synchronous>, transform_indices = @transform_4, window_bounds = array<i64: 1, 32>}, {pipeline_mode = #tpu.pipeline_mode<synchronous>, transform_indices = @transform_5, window_bounds = array<i64: 16, 32>}]} {
    %c0 = arith.constant 0 : index
    %c0_0 = arith.constant 0 : index
    %0 = vector.load %arg1[%c0, %c0_0] : memref<16x32xf32, #tpu.memory_space<vmem>>, vector<16x32xf32>
    %c0_1 = arith.constant 0 : index
    %c0_2 = arith.constant 0 : index
    %1 = vector.load %arg2[%c0_1, %c0_2] : memref<32x64xf32, #tpu.memory_space<vmem>>, vector<32x64xf32>
    %cst = arith.constant dense<0.000000e+00> : vector<16x64xf32>
    %2 = tpu.matmul %0, %1, %cst {dimension_numbers = #tpu.dot_dimension_numbers<[1], [0], [0], [1], [0, 0, 1, 1], [], []>} : vector<16x32xf32>, vector<32x64xf32>, vector<16x64xf32> -> vector<16x64xf32>
    %c0_3 = arith.constant 0 : index
    %c0_4 = arith.constant 0 : index
    %3 = vector.load %arg3[%c0_3, %c0_4] : memref<1x64xf32, #tpu.memory_space<vmem>>, vector<1x64xf32>
    %4 = vector.broadcast %3 : vector<1x64xf32> to vector<16x64xf32>
    %5 = arith.addf %2, %4 : vector<16x64xf32>
    %cst_5 = arith.constant 0.000000e+00 : f32
    %6 = vector.broadcast %cst_5 : f32 to vector<16x64xf32>
    %7 = arith.maximumf %5, %6 : vector<16x64xf32>
    %c0_6 = arith.constant 0 : index
    %c0_7 = arith.constant 0 : index
    %8 = vector.load %arg4[%c0_6, %c0_7] : memref<64x32xf32, #tpu.memory_space<vmem>>, vector<64x32xf32>
    %cst_8 = arith.constant dense<0.000000e+00> : vector<16x32xf32>
    %9 = tpu.matmul %7, %8, %cst_8 {dimension_numbers = #tpu.dot_dimension_numbers<[1], [0], [0], [1], [0, 0, 1, 1], [], []>} : vector<16x64xf32>, vector<64x32xf32>, vector<16x32xf32> -> vector<16x32xf32>
    %c0_9 = arith.constant 0 : index
    %c0_10 = arith.constant 0 : index
    %10 = vector.load %arg5[%c0_9, %c0_10] : memref<1x32xf32, #tpu.memory_space<vmem>>, vector<1x32xf32>
    %11 = vector.broadcast %10 : vector<1x32xf32> to vector<16x32xf32>
    %12 = arith.addf %9, %11 : vector<16x32xf32>
    %c0_11 = arith.constant 0 : index
    %c0_12 = arith.constant 0 : index
    %13 = vector.load %arg6[%c0_11, %c0_12] : memref<16x32xf32, #tpu.memory_space<vmem>>, vector<16x32xf32>
    tpu.vector_store %arg6[%c0_11, %c0_12], %12 {strides = array<i32>} : memref<16x32xf32, #tpu.memory_space<vmem>>, vector<16x32xf32>,
    return
  }
  func.func @transform_0(%arg0: i32) -> (i32, i32) {
    %c0_i32 = arith.constant 0 : i32
    %c0_i32_0 = arith.constant 0 : i32
    %c0_i32_1 = arith.constant 0 : i32
    return %c0_i32, %c0_i32_0 : i32, i32
  }
  func.func @transform_1(%arg0: i32) -> (i32, i32) {
    %c0_i32 = arith.constant 0 : i32
    %c0_i32_0 = arith.constant 0 : i32
    %c0_i32_1 = arith.constant 0 : i32
    return %c0_i32, %c0_i32_0 : i32, i32
  }
  func.func @transform_2(%arg0: i32) -> (i32, i32) {
    %c0_i32 = arith.constant 0 : i32
    %c0_i32_0 = arith.constant 0 : i32
    %c0_i32_1 = arith.constant 0 : i32
    return %c0_i32, %c0_i32_0 : i32, i32
  }
  func.func @transform_3(%arg0: i32) -> (i32, i32) {
    %c0_i32 = arith.constant 0 : i32
    %c0_i32_0 = arith.constant 0 : i32
    %c0_i32_1 = arith.constant 0 : i32
    return %c0_i32, %c0_i32_0 : i32, i32
  }
  func.func @transform_4(%arg0: i32) -> (i32, i32) {
    %c0_i32 = arith.constant 0 : i32
    %c0_i32_0 = arith.constant 0 : i32
    %c0_i32_1 = arith.constant 0 : i32
    return %c0_i32, %c0_i32_0 : i32, i32
  }
  func.func @transform_5(%arg0: i32) -> (i32, i32) {
    %c0_i32 = arith.constant 0 : i32
    %c0_i32_0 = arith.constant 0 : i32
    %c0_i32_1 = arith.constant 0 : i32
    return %c0_i32, %c0_i32_0 : i32, i32
  }
}

</mosaic_0001>

<bundles_post_ra>
// kernel: tpu_custom_call.1
= control target key start
LH: loop header
LB: loop body
LE: loop exit
PB: predicated region body
PF: predicated region fallthrough
CT: control target
= control target key end

     0   :  { %vm34_vm0 = vcmask 261120   ;;  %s433_s0 = inlined_call_operand.vmem [shape: f32[16,32], index: 0, kind: input, shape index: {}]   ;;  %s434_s1 = inlined_call_operand.vmem [shape: f32[32,64], index: 1, kind: input, shape index: {}]   ;;  %s435_s2 = inlined_call_operand.vmem [shape: f32[1,64], index: 2, kind: input, shape index: {}]   ;;  %s436_s3 = inlined_call_operand.vmem [shape: f32[64,32], index: 3, kind: input, shape index: {}]   ;;  %s437_s4 = inlined_call_operand.vmem [shape: f32[1,32], index: 4, kind: input, shape index: {}]   ;;  %s438_s5 = inlined_call_operand.hbm [shape: f32[16,32], index: 5, kind: output, shape index: {}]  }
   0x1   :  { %v23_v0 = vld [vmem:[%s434_s1] sm:$0xff]  ;;  %v24_v1 = vld [vmem:[%s434_s1 + $0x8] sm:$0xff]  ;;  %v25_v2 = vld [vmem:[%s434_s1 + $0x10] sm:$0xff] }
   0x2   :  { %v285_v3 = vpack.c.bf16 %v24_v1, %v23_v0  ;;  %v26_v4 = vld [vmem:[%s434_s1 + $0x18] sm:$0xff]  ;;  %v21_v5 = vld [vmem:[%s433_s0] sm:$0xff]  ;;  %v119_v8 = vld [vmem:[%s436_s3 + $0x8] sm:$0xff] }
   0x3   :  { %v289_v6 = vpack.c.bf16 %v26_v4, %v25_v2  ;;  %263 = vmatprep.mubr.msk.f32.mxu0 %vm34_vm0, %v21_v5  ;;  %v118_v7 = vld [vmem:[%s436_s3] sm:$0xff]  ;;  %v120_v9 = vld [vmem:[%s436_s3 + $0x10] sm:$0xff]  ;;  %v121_v11 = vld [vmem:[%s436_s3 + $0x18] sm:$0xff] }
   0x4   :  { %286 = vmatprep.subr.bf16.mxu0 %v285_v3  ;;  %v293_v10 = vpack.c.bf16 %v119_v8, %v118_v7  ;;  %v297_v12 = vpack.c.bf16 %v121_v11, %v120_v9  ;;  %v122_v13 = vld [vmem:[%s436_s3 + $0x20] sm:$0xff]  ;;  %v123_v14 = vld [vmem:[%s436_s3 + $0x28] sm:$0xff] }
   0x5   :  { %288 = vmatpush3.bf16.msra.mxu0 %v285_v3 }
   0x6   :  { %10 = vsyncpa [#allocation3], 0  ;;  %290 = vmatprep.subr.bf16.mxu0 %v289_v6  ;;  %294 = vmatprep.subr.bf16.mxu1 %v293_v10  ;;  %v301_v15 = vpack.c.bf16 %v123_v14, %v122_v13  ;;  %v22_v16 = vld [vmem:[%s433_s0 + $0x8] sm:$0xff]  ;;  %v124_v17 = vld [vmem:[%s436_s3 + $0x30] sm:$0xff]  ;;  %vm133_vm1 = vcmask 523264  }
   0x7   :  { %296 = vmatpush3.bf16.msra.mxu1 %v293_v10  ;;  %v125_v18 = vld [vmem:[%s436_s3 + $0x38] sm:$0xff]  ;;  %v233_v20 = vld [vmem:[%s435_s2] ss:$0 sm:$0xff]  ;;  %s336_s3 = smov [#allocation2]  }
   0x8   :  { %298 = vmatprep.subr.bf16.mxu1 %v297_v12  ;;  %v305_v19 = vpack.c.bf16 %v125_v18, %v124_v17  ;;  %v236_v27 = vld [vmem:[%s437_s4] ss:$0 sm:$0xff]  ;;  %s222_s23 = sshll.u32 %s336_s3, 4  ;;  %s223_s23 = int_to_ptr.vmem [resolvable:$true] %s222_s23 }
   0x9   :  { %292 = vmatpush3.bf16.msra.mxu0 %v289_v6  ;;  %s312_s2 = scalar_lea.vmem %s223_s23, 256  ;;  %p317_p1 = scmp.lt.s32.totalorder %s223_s23, %s223_s23 }
   0xa   :  { %p313_p0 = scmp.ne.s32.totalorder %s223_s23, %s312_s2  ;;  %p318_p2 = scmp.lt.s32.totalorder %s312_s2, %s312_s2 }
   0xb   :  { %300 = vmatpush3.bf16.msra.mxu1 %v297_v12 }
   0xc   :  { %264 = vmatmul.mubr.msk.f32.vlgmr.msra.gmra.mrb[0].mxu0 %vm34_vm0, %v22_v16  ;;  %302 = vmatprep.subr.bf16.mxu1 %v301_v15  ;;  %p319_p3 = por %p318_p2, %p317_p1 }
   0xe   :  { %p320_p4 = pnand %p319_p3, %p313_p0 }
   0xf   :  { %304 = vmatpush3.bf16.msra.mxu1 %v301_v15 }
  0x10   :  { %306 = vmatprep.subr.bf16.mxu1 %v305_v19 }
  0x13   :  { %308 = vmatpush3.bf16.msra.mxu1 %v305_v19 }
  0xdf   :  { %v265_v21 = vpop.f32.mrb[0].mxu0 }
  0xe0   :  { %v113_v22 = vadd.f32 %v265_v21, %v233_v20  ;;  %v107_v23 = vpop.f32.mrb[1].mxu0 }
  0xe1   :  { %v108_v24 = vadd.f32 %v233_v20, %v107_v23 }
  0xe2   :  { %v117_v26 = vmax.f32 %v113_v22, 0.0 }
  0xe3   :  { %v116_v25 = vmax.f32 %v108_v24, 0.0 }
  0xe5   :  { %282 = vmatprep.mubr.msk.f32.mxu1 %vm133_vm1, %v116_v25 }
  0xe6   :  { %283 = vmatmul.mubr.msk.f32.vlgmr.msra.gmra.mrb[0].mxu1 %vm133_vm1, %v117_v26 }
 0x1b9   :  { %v284_v28 = vpop.f32.mrb[0].mxu1 }
 0x1ba   :  { %v212_v29 = vadd.f32 %v284_v28, %v236_v27  ;;  %v206_v30 = vpop.f32.mrb[1].mxu1 }
 0x1bb   :  { %v207_v31 = vadd.f32 %v236_v27, %v206_v30 }
 0x1bc   :  { %216 = vst.msk [vmem:[#allocation2 + $0x8] sm:$0xff] %vm34_vm0, %v212_v29 }
 0x1bd   :  { %215 = vst.msk [vmem:[#allocation2] sm:$0xff] %vm34_vm0, %v207_v31 }
 0x1be   :  { %323 = shalt.err (!%p320_p4)
}
 0x1bf   :  { %s324_s25 = scalar_lea.hbm %s438_s5, 256 }
 0x1c0   :  { %p325_p5 = scmp.ne.s32.totalorder %s438_s5, %s324_s25  ;;  %p328_p6 = scmp.lt.u32.totalorder %s324_s25, %s438_s5 }
 0x1c2   :  { %p330_p7 = pnand %p328_p6, %p325_p5 }
 0x1c4   :  { %333 = shalt.err (!%p330_p7)
}
 0x1c5   :  { %s337_s30 = smov 128   ;;  %s338_s6 = smov 8  }
 0x1c6   :  { %228 = dma.vmem_to_hbm [thread:$0]  %s223_s23, 256, %s438_s5, [#allocation3], %s337_s30, %s337_s30, %s338_s6  }
 0x1c7   :  { %334 = dma.done.wait [#allocation3], 256  }
 0x1c8   :  { %335 = vsyncadd [#allocation3], 4294967040 }
 0x1c9   :  { %232 = vsyncpa [#allocation3], 1 }

</bundles_post_ra>
